<compile_context>
chip_gen: v5e
topology: v5e:2x2
jax: 0.10.0
libtpu: 0.0.40
codegen_flags: <defaults>
</compile_context>

<pallas_src>
import functools
import math

import jax
import jax.numpy as jnp
from jax.experimental import pallas as pl
from jax.experimental.pallas import tpu as pltpu


# ----------------------------- Pallas kernel -----------------------------

def _ffl_kernel(pred_ref, targ_ref, dft_ref, o_ref, *, hw, alpha, log_matrix,
                scale):
    """One row-tile of the focal frequency loss.

    pred_ref / targ_ref : (TM, HW)     flattened (n, patch, c) images
    dft_ref             : (HW, 2*HW)   [real | imag] columns of the 2-D DFT matrix
    o_ref               : (1, 1)       scalar loss accumulator (grid-resident)
    """
    @pl.when(pl.program_id(0) == 0)
    def _init():
        o_ref[...] = jnp.zeros_like(o_ref)

    d = pred_ref[...] - targ_ref[...]                       # (TM, HW) f32
    # fft2(pred) - fft2(target) == fft2(pred - target): one fused MXU matmul
    # yields real (cols [0, HW)) and imag (cols [HW, 2HW)) spectra.
    f = jnp.dot(d, dft_ref[...], preferred_element_type=jnp.float32)
    fr = f[:, :hw]
    fi = f[:, hw:]

    dist = fr * fr + fi * fi                                # |F(pred) - F(target)|^2
    w = jnp.sqrt(dist)
    if alpha != 1.0:
        w = w ** alpha
    if log_matrix:
        w = jnp.log(w + 1.0)
    # Per-(n, patch, c) normalization by the spectrum max.  An all-zero row
    # (0/0 -> NaN -> 0 in the reference) maps to weight 0 via the guard.
    row_max = jnp.max(w, axis=-1, keepdims=True)            # (TM, 1)
    inv_max = jnp.where(row_max > 0.0, 1.0 / row_max, 0.0)  # only TM reciprocals
    w = jnp.clip(w * inv_max, 0.0, 1.0)

    o_ref[...] += jnp.sum(w * dist)

    @pl.when(pl.program_id(0) == pl.num_programs(0) - 1)
    def _finalize():
        o_ref[...] = o_ref[...] * scale                     # mean * loss_weight


# ----------------------------- glue (constants / layout) -----------------------------

def _dft_matrix(n):
    """Orthonormal 1-D DFT matrix (real, imag), each (n, n) f32."""
    k = jnp.arange(n, dtype=jnp.int32)
    m = (k[:, None] * k[None, :]) % n                       # exact phase index (no fp drift)
    ang = (-2.0 * math.pi / n) * m.astype(jnp.float32)
    s = 1.0 / math.sqrt(n)
    return jnp.cos(ang) * s, jnp.sin(ang) * s


def _dft2_matrix(h, w):
    """(HW, 2*HW) [real | imag] matrix D with vec(fft2(x, 'ortho')) = D @ vec(x)."""
    hr, hi = _dft_matrix(h)
    wr, wi = _dft_matrix(w)
    dr = jnp.kron(hr, wr) - jnp.kron(hi, wi)
    di = jnp.kron(hr, wi) + jnp.kron(hi, wr)
    return jnp.concatenate([dr, di], axis=1)


def _to_rows(x, patch_factor):
    """(N, C, H, W) -> (N*P*C, ph*pw) rows matching torch.stack(patch_list, 1)."""
    n, c, h, w = x.shape
    ph, pw = h // patch_factor, w // patch_factor
    x = x.reshape(n, c, patch_factor, ph, patch_factor, pw)
    x = jnp.transpose(x, (0, 2, 4, 1, 3, 5))                # (N, pi, pj, C, ph, pw)
    return x.reshape(n * patch_factor * patch_factor * c, ph * pw), (ph, pw)


def _round_up(x, m):
    return ((x + m - 1) // m) * m


def focal_frequency_loss(pred, target, *, loss_weight=1.0, alpha=1.0,
                         patch_factor=1, ave_spectrum=False, log_matrix=False,
                         batch_matrix=False, row_block=256):
    """Focal frequency loss; defaults match the PyTorch module (matrix=None path)."""
    if batch_matrix:
        # TODO(synk): batch_matrix normalizes by a batch-global max (cross-tile
        # statistic); only the default per-(n, patch, c) normalization is implemented.
        raise NotImplementedError("batch_matrix not supported")

    pred = pred.astype(jnp.float32)
    target = target.astype(jnp.float32)
    if ave_spectrum:
        # mean_n fft2(x_n) == fft2(mean_n x_n): batch-average spectra via linearity.
        pred = jnp.mean(pred, axis=0, keepdims=True)
        target = jnp.mean(target, axis=0, keepdims=True)

    pred_rows, (ph, pw) = _to_rows(pred, patch_factor)
    targ_rows, _ = _to_rows(target, patch_factor)
    n_rows, hw = pred_rows.shape
    dft = _dft2_matrix(ph, pw)                              # (HW, 2*HW) constant

    # Row tiling: TM rows per grid step (sublane aligned), capped so each
    # double-buffered (TM, HW) input tile stays <= ~2 MiB of VMEM.
    tm = min(row_block, _round_up(n_rows, 8))
    tm = max(8, _round_up(tm, 8))
    max_tm = max(8, ((2 * 1024 * 1024) // (4 * hw)) // 8 * 8)
    tm = min(tm, max_tm)
    rows_pad = _round_up(n_rows, tm)
    if rows_pad != n_rows:
        pad = ((0, rows_pad - n_rows), (0, 0))
        pred_rows = jnp.pad(pred_rows, pad)
        targ_rows = jnp.pad(targ_rows, pad)
    grid = rows_pad // tm

    # mean over all (N, P, C, H, W) elements, times loss_weight.
    scale = float(loss_weight) / float(n_rows * hw)

    kernel = functools.partial(_ffl_kernel, hw=hw, alpha=float(alpha),
                               log_matrix=bool(log_matrix), scale=scale)

    out = pl.pallas_call(
        kernel,
        grid=(grid,),
        in_specs=[
            pl.BlockSpec((tm, hw), lambda i: (i, 0)),       # pred rows (pipelined)
            pl.BlockSpec((tm, hw), lambda i: (i, 0)),       # target rows (pipelined)
            pl.BlockSpec((hw, 2 * hw), lambda i: (0, 0)),   # DFT [re|im], VMEM resident
        ],
        out_specs=pl.BlockSpec((1, 1), lambda i: (0, 0)),   # scalar accumulator
        out_shape=jax.ShapeDtypeStruct((1, 1), jnp.float32),
        compiler_params=pltpu.CompilerParams(
            dimension_semantics=("arbitrary",),             # reduction axis
            vmem_limit_bytes=100 * 1024 * 1024),
        cost_estimate=pl.CostEstimate(
            flops=int(4 * rows_pad * hw * hw + 12 * rows_pad * hw),
            transcendentals=int(rows_pad * hw),
            bytes_accessed=int(4 * (2 * rows_pad * hw + 2 * hw * hw + 1))),
    )(pred_rows, targ_rows, dft)
    return out[0, 0]


# ----------------------------- pure-JAX reference (sanity check only) -----------------------------

def _reference_ffl(pred, target, *, loss_weight=1.0, alpha=1.0, patch_factor=1,
                   ave_spectrum=False, log_matrix=False):
    def to_freq(x):
        n, c, h, w = x.shape
        ph, pw = h // patch_factor, w // patch_factor
        x = x.reshape(n, c, patch_factor, ph, patch_factor, pw)
        x = jnp.transpose(x, (0, 2, 4, 1, 3, 5))
        x = x.reshape(n, patch_factor * patch_factor, c, ph, pw)
        return jnp.fft.fft2(x, norm="ortho")

    fp = to_freq(pred.astype(jnp.float32))
    ft = to_freq(target.astype(jnp.float32))
    if ave_spectrum:
        fp = jnp.mean(fp, axis=0, keepdims=True)
        ft = jnp.mean(ft, axis=0, keepdims=True)
    diff = fp - ft
    dist = jnp.real(diff) ** 2 + jnp.imag(diff) ** 2
    w = jnp.sqrt(dist) ** alpha
    if log_matrix:
        w = jnp.log(w + 1.0)
    w = w / jnp.max(w, axis=(-2, -1), keepdims=True)
    w = jnp.nan_to_num(w, nan=0.0)
    w = jnp.clip(w, 0.0, 1.0)
    return jnp.mean(w * dist) * loss_weight


if __name__ == "__main__":
    key = jax.random.PRNGKey(0)
    k1, k2 = jax.random.split(key)

    # Small shapes consistent with the module's (N, C, H, W) image inputs.
    N, C, H, W = 2, 8, 16, 16
    pred = jax.random.uniform(k1, (N, C, H, W), jnp.float32)
    target = jax.random.uniform(k2, (N, C, H, W), jnp.float32)

    # row_block=8 splits the N*C = 16 image rows over 2 grid steps to exercise
    # the tiled, double-buffered accumulation path.
    loss_fn = jax.jit(functools.partial(focal_frequency_loss, row_block=8))
    loss = loss_fn(pred, target)
    jax.block_until_ready(loss)

    ref = _reference_ffl(pred, target)
    rel = abs(float(loss) - float(ref)) / max(abs(float(ref)), 1e-12)
    if rel > 2e-2:
        raise AssertionError(
            f"kernel={float(loss)} reference={float(ref)} rel_err={rel}")
    print("KERNEL_OK")
</pallas_src>

<mosaic_0001>
module attributes {stable_mosaic.version = 11 : i64} {
  func.func @_ffl_kernel(%arg0: i32, %arg1: memref<8x256xf32, #tpu.memory_space<vmem>>, %arg2: memref<8x256xf32, #tpu.memory_space<vmem>>, %arg3: memref<256x512xf32, #tpu.memory_space<vmem>>, %arg4: memref<1x1xf32, #tpu.memory_space<vmem>>) attributes {dimension_semantics = [#tpu.dimension_semantics<arbitrary>], iteration_bounds = array<i64: 2>, scalar_prefetch = 0 : i64, scratch_operands = 0 : i64, tpu.core_type = #tpu.core_type<tc>, window_params = [{transform_indices = @transform_0, window_bounds = array<i64: 8, 256>}, {transform_indices = @transform_1, window_bounds = array<i64: 8, 256>}, {pipeline_mode = #tpu.pipeline_mode<synchronous>, transform_indices = @transform_2, window_bounds = array<i64: 256, 512>}, {pipeline_mode = #tpu.pipeline_mode<synchronous>, transform_indices = @transform_3, window_bounds = array<i64: 1, 1>}]} {
    %c0_i32 = arith.constant 0 : i32
    %0 = arith.cmpi eq, %arg0, %c0_i32 : i32
    %1 = arith.extui %0 : i1 to i32
    %c0_i32_0 = arith.constant 0 : i32
    %2 = arith.cmpi ne, %1, %c0_i32_0 : i32
    scf.if %2 {
      %cst_18 = arith.constant 0.000000e+00 : f32
      %40 = vector.broadcast %cst_18 : f32 to vector<1x1xf32>
      %c0_19 = arith.constant 0 : index
      %c0_20 = arith.constant 0 : index
      %41 = vector.load %arg4[%c0_19, %c0_20] : memref<1x1xf32, #tpu.memory_space<vmem>>, vector<1x1xf32>
      tpu.vector_store %arg4[%c0_19, %c0_20], %40 {strides = array<i32>} : memref<1x1xf32, #tpu.memory_space<vmem>>, vector<1x1xf32>,
    } else {
    }
    %c0 = arith.constant 0 : index
    %c0_1 = arith.constant 0 : index
    %3 = vector.load %arg1[%c0, %c0_1] : memref<8x256xf32, #tpu.memory_space<vmem>>, vector<8x256xf32>
    %c0_2 = arith.constant 0 : index
    %c0_3 = arith.constant 0 : index
    %4 = vector.load %arg2[%c0_2, %c0_3] : memref<8x256xf32, #tpu.memory_space<vmem>>, vector<8x256xf32>
    %5 = arith.subf %3, %4 : vector<8x256xf32>
    %c0_4 = arith.constant 0 : index
    %c0_5 = arith.constant 0 : index
    %6 = vector.load %arg3[%c0_4, %c0_5] : memref<256x512xf32, #tpu.memory_space<vmem>>, vector<256x512xf32>
    %cst = arith.constant dense<0.000000e+00> : vector<8x512xf32>
    %7 = tpu.matmul %5, %6, %cst {dimension_numbers = #tpu.dot_dimension_numbers<[1], [0], [0], [1], [0, 0, 1, 1], [], []>} : vector<8x256xf32>, vector<256x512xf32>, vector<8x512xf32> -> vector<8x512xf32>
    %8 = vector.extract_strided_slice %7 {offsets = [0, 0], sizes = [8, 256], strides = [1, 1]} : vector<8x512xf32> to vector<8x256xf32>
    %9 = vector.extract_strided_slice %7 {offsets = [0, 256], sizes = [8, 256], strides = [1, 1]} : vector<8x512xf32> to vector<8x256xf32>
    %10 = arith.mulf %8, %8 : vector<8x256xf32>
    %11 = arith.mulf %9, %9 : vector<8x256xf32>
    %12 = arith.addf %10, %11 : vector<8x256xf32>
    %13 = math.sqrt %12 : vector<8x256xf32>
    %cst_6 = arith.constant dense<0xFF800000> : vector<8xf32>
    %14 = vector.multi_reduction <maximumf>, %13, %cst_6 [1] : vector<8x256xf32> to vector<8xf32>
    %15 = vector.shape_cast %14 : vector<8xf32> to vector<8x1xf32>
    %cst_7 = arith.constant 0.000000e+00 : f32
    %16 = vector.broadcast %cst_7 : f32 to vector<8x1xf32>
    %17 = arith.cmpf ogt, %15, %16 : vector<8x1xf32>
    %cst_8 = arith.constant 1.000000e+00 : f32
    %18 = vector.broadcast %cst_8 : f32 to vector<8x1xf32>
    %19 = arith.divf %18, %15 : vector<8x1xf32>
    %cst_9 = arith.constant 0.000000e+00 : f32
    %20 = vector.broadcast %cst_9 : f32 to vector<8x1xf32>
    %21 = arith.select %17, %19, %20 : vector<8x1xi1>, vector<8x1xf32>
    %22 = vector.broadcast %21 : vector<8x1xf32> to vector<8x256xf32>
    %23 = arith.mulf %13, %22 : vector<8x256xf32>
    %cst_10 = arith.constant 0.000000e+00 : f32
    %cst_11 = arith.constant 1.000000e+00 : f32
    %24 = vector.broadcast %cst_10 : f32 to vector<8x256xf32>
    %25 = arith.maximumf %24, %23 : vector<8x256xf32>
    %26 = vector.broadcast %cst_11 : f32 to vector<8x256xf32>
    %27 = arith.minimumf %26, %25 : vector<8x256xf32>
    %c0_12 = arith.constant 0 : index
    %c0_13 = arith.constant 0 : index
    %28 = vector.load %arg4[%c0_12, %c0_13] : memref<1x1xf32, #tpu.memory_space<vmem>>, vector<1x1xf32>
    %29 = arith.mulf %27, %12 : vector<8x256xf32>
    %30 = vector.shape_cast %29 : vector<8x256xf32> to vector<1x8x256xf32>
    %cst_14 = arith.constant dense<0.000000e+00> : vector<1xf32>
    %31 = vector.multi_reduction <add>, %30, %cst_14 [1, 2] : vector<1x8x256xf32> to vector<1xf32>
    %32 = vector.shape_cast %31 : vector<1xf32> to vector<1x1x1xf32>
    %33 = vector.extract %32[0, 0, 0] : f32 from vector<1x1x1xf32>
    %34 = vector.broadcast %33 : f32 to vector<1x1xf32>
    %35 = arith.addf %28, %34 : vector<1x1xf32>
    %c0_15 = arith.constant 0 : index
    %c0_16 = arith.constant 0 : index
    %36 = vector.load %arg4[%c0_15, %c0_16] : memref<1x1xf32, #tpu.memory_space<vmem>>, vector<1x1xf32>
    tpu.vector_store %arg4[%c0_15, %c0_16], %35 {strides = array<i32>} : memref<1x1xf32, #tpu.memory_space<vmem>>, vector<1x1xf32>,
    %c1_i32 = arith.constant 1 : i32
    %37 = arith.cmpi eq, %arg0, %c1_i32 : i32
    %38 = arith.extui %37 : i1 to i32
    %c0_i32_17 = arith.constant 0 : i32
    %39 = arith.cmpi ne, %38, %c0_i32_17 : i32
    scf.if %39 {
      %c0_18 = arith.constant 0 : index
      %c0_19 = arith.constant 0 : index
      %40 = vector.load %arg4[%c0_18, %c0_19] : memref<1x1xf32, #tpu.memory_space<vmem>>, vector<1x1xf32>
      %cst_20 = arith.constant 2.44140625E-4 : f32
      %41 = vector.broadcast %cst_20 : f32 to vector<1x1xf32>
      %42 = arith.mulf %40, %41 : vector<1x1xf32>
      %c0_21 = arith.constant 0 : index
      %c0_22 = arith.constant 0 : index
      %43 = vector.load %arg4[%c0_21, %c0_22] : memref<1x1xf32, #tpu.memory_space<vmem>>, vector<1x1xf32>
      tpu.vector_store %arg4[%c0_21, %c0_22], %42 {strides = array<i32>} : memref<1x1xf32, #tpu.memory_space<vmem>>, vector<1x1xf32>,
    } else {
    }
    return
  }
  func.func @transform_0(%arg0: i32) -> (i32, i32) {
    %c0_i32 = arith.constant 0 : i32
    %c0_i32_0 = arith.constant 0 : i32
    return %arg0, %c0_i32 : i32, i32
  }
  func.func @transform_1(%arg0: i32) -> (i32, i32) {
    %c0_i32 = arith.constant 0 : i32
    %c0_i32_0 = arith.constant 0 : i32
    return %arg0, %c0_i32 : i32, i32
  }
  func.func @transform_2(%arg0: i32) -> (i32, i32) {
    %c0_i32 = arith.constant 0 : i32
    %c0_i32_0 = arith.constant 0 : i32
    %c0_i32_1 = arith.constant 0 : i32
    return %c0_i32, %c0_i32_0 : i32, i32
  }
  func.func @transform_3(%arg0: i32) -> (i32, i32) {
    %c0_i32 = arith.constant 0 : i32
    %c0_i32_0 = arith.constant 0 : i32
    %c0_i32_1 = arith.constant 0 : i32
    return %c0_i32, %c0_i32_0 : i32, i32
  }
}

</mosaic_0001>

<bundles_post_ra>
// kernel: focal_frequency_loss.1
= control target key start
LH: loop header
LB: loop body
LE: loop exit
PB: predicated region body
PF: predicated region fallthrough
CT: control target
= control target key end

     0   :  { %8 = vsyncpa [#allocation3], 0  ;;  %s719_s12 = smov 0   ;;  %s1138_s0 = inlined_call_operand.vmem [shape: f32[16,256], index: 0, kind: input, shape index: {}]   ;;  %s1139_s1 = inlined_call_operand.vmem [shape: f32[16,256], index: 1, kind: input, shape index: {}]   ;;  %s1140_s2 = inlined_call_operand.vmem [shape: f32[256,512], index: 2, kind: input, shape index: {}]   ;;  %s1141_s3 = inlined_call_operand.hbm [shape: f32[1,1], index: 3, kind: output, shape index: {}]  }
   0x1 LB: > { %s725_s13 = sadd.s32 4294967295, %s695_s12   ;;  %p620_p0 = scmp.ge.s32.totalorder %s695_s12, 1  ;;  %s695_s12 = sphi %s719_s12, %s14_s12  }
   0x2   : > { %p143_p1 = scmp.lt.s32.totalorder %s695_s12, 3 }
   0x4   : > { %p144_p2 = pnand %p620_p0, %p143_p1 }
   0x5   : > { %p167_p3 = scmp.lt.s32.totalorder (!%p144_p2), %s725_s13, 1  ;;  %p625_p4 = scmp.ne.s32.totalorder (!%p144_p2), %s725_s13, 0 }
   0x6   : > { %147 = sbr.rel (%p144_p2) target bundleno = 589 (0x24d), region = 32 }
   0xb   : > { %s168_s14 = scalar_select %p167_p3, %s725_s13, 1 }
   0xc   : > { %180 = sbr.rel (%p625_p4) target bundleno = 19 (0x13), region = 36 }
   0xd   : > { %s631_s15 = sshll.u32 %s168_s14, 4 }
   0xe   : > { %s734_s18 = scalar_lea.vmem %s1138_s0, %s631_s15  ;;  %s739_s21 = scalar_lea.vmem %s1139_s1, %s631_s15 }
  0x11   : > { %vm181_vm0 = vcmask 0   ;;  %v697_v0 = vmov 0.0  }
  0x12   : > { %182 = vst.msk [vmem:[#allocation2] sm:$0x1] %vm181_vm0, %v697_v0 }
  0x13 PF: > { %v249_v1 = vld [vmem:[%s1140_s2 + $0x1e0] sm:$0xff]  ;;  %v250_v3 = vld [vmem:[%s1140_s2 + $0x1e8] sm:$0xff]  ;;  %vm548_vm10 = vcmask 0   ;;  %p626_p5 = scmp.ne.s32.totalorder %s725_s13, 1 }
  0x14   : > { %v313_v2 = vld [vmem:[%s1140_s2 + $0x3e0] sm:$0xff]  ;;  %317 = vmatpush.msra.mxu0 %v249_v1  ;;  %v314_v4 = vld [vmem:[%s1140_s2 + $0x3e8] sm:$0xff]  ;;  %357 = vmatpush.msra.mxu2 %v250_v3  ;;  %v251_v1 = vld [vmem:[%s1140_s2 + $0x1f0] sm:$0xff] }
  0x15   : > { %337 = vmatpush.msra.mxu1 %v313_v2  ;;  %v245_v5 = vld [vmem:[%s1140_s2 + $0x1c0] sm:$0xff]  ;;  %377 = vmatpush.msra.mxu3 %v314_v4  ;;  %v246_v7 = vld [vmem:[%s1140_s2 + $0x1c8] sm:$0xff]  ;;  %v315_v2 = vld [vmem:[%s1140_s2 + $0x3f0] sm:$0xff] }
  0x16   : > { %v309_v6 = vld [vmem:[%s1140_s2 + $0x3c0] sm:$0xff]  ;;  %v310_v8 = vld [vmem:[%s1140_s2 + $0x3c8] sm:$0xff]  ;;  %318 = vmatpush.msra.mxu0 %v245_v5  ;;  %358 = vmatpush.msra.mxu2 %v246_v7  ;;  %v252_v3 = vld [vmem:[%s1140_s2 + $0x1f8] sm:$0xff] }
  0x17   : > { %v241_v9 = vld [vmem:[%s1140_s2 + $0x1a0] sm:$0xff]  ;;  %338 = vmatpush.msra.mxu1 %v309_v6  ;;  %v242_v11 = vld [vmem:[%s1140_s2 + $0x1a8] sm:$0xff]  ;;  %378 = vmatpush.msra.mxu3 %v310_v8  ;;  %v316_v4 = vld [vmem:[%s1140_s2 + $0x3f8] sm:$0xff] }
  0x18   : > { %v305_v10 = vld [vmem:[%s1140_s2 + $0x3a0] sm:$0xff]  ;;  %v306_v12 = vld [vmem:[%s1140_s2 + $0x3a8] sm:$0xff]  ;;  %319 = vmatpush.msra.mxu0 %v241_v9  ;;  %359 = vmatpush.msra.mxu2 %v242_v11  ;;  %v247_v5 = vld [vmem:[%s1140_s2 + $0x1d0] sm:$0xff] }
  0x19   : > { %v237_v13 = vld [vmem:[%s1140_s2 + $0x180] sm:$0xff]  ;;  %339 = vmatpush.msra.mxu1 %v305_v10  ;;  %v238_v15 = vld [vmem:[%s1140_s2 + $0x188] sm:$0xff]  ;;  %379 = vmatpush.msra.mxu3 %v306_v12  ;;  %v311_v6 = vld [vmem:[%s1140_s2 + $0x3d0] sm:$0xff] }
  0x1a   : > { %v301_v14 = vld [vmem:[%s1140_s2 + $0x380] sm:$0xff]  ;;  %v302_v16 = vld [vmem:[%s1140_s2 + $0x388] sm:$0xff]  ;;  %320 = vmatpush.msra.mxu0 %v237_v13  ;;  %360 = vmatpush.msra.mxu2 %v238_v15  ;;  %v248_v7 = vld [vmem:[%s1140_s2 + $0x1d8] sm:$0xff] }
  0x1b   : > { %v233_v17 = vld [vmem:[%s1140_s2 + $0x160] sm:$0xff]  ;;  %340 = vmatpush.msra.mxu1 %v301_v14  ;;  %v234_v19 = vld [vmem:[%s1140_s2 + $0x168] sm:$0xff]  ;;  %380 = vmatpush.msra.mxu3 %v302_v16  ;;  %v312_v8 = vld [vmem:[%s1140_s2 + $0x3d8] sm:$0xff] }
  0x1c   : > { %v297_v18 = vld [vmem:[%s1140_s2 + $0x360] sm:$0xff]  ;;  %v298_v20 = vld [vmem:[%s1140_s2 + $0x368] sm:$0xff]  ;;  %321 = vmatpush.msra.mxu0 %v233_v17  ;;  %361 = vmatpush.msra.mxu2 %v234_v19  ;;  %v243_v9 = vld [vmem:[%s1140_s2 + $0x1b0] sm:$0xff] }
  0x1d   : > { %v229_v21 = vld [vmem:[%s1140_s2 + $0x140] sm:$0xff]  ;;  %341 = vmatpush.msra.mxu1 %v297_v18  ;;  %v230_v23 = vld [vmem:[%s1140_s2 + $0x148] sm:$0xff]  ;;  %381 = vmatpush.msra.mxu3 %v298_v20  ;;  %v307_v10 = vld [vmem:[%s1140_s2 + $0x3b0] sm:$0xff] }
  0x1e   : > { %v293_v22 = vld [vmem:[%s1140_s2 + $0x340] sm:$0xff]  ;;  %v294_v24 = vld [vmem:[%s1140_s2 + $0x348] sm:$0xff]  ;;  %322 = vmatpush.msra.mxu0 %v229_v21  ;;  %362 = vmatpush.msra.mxu2 %v230_v23  ;;  %v244_v11 = vld [vmem:[%s1140_s2 + $0x1b8] sm:$0xff] }
  0x1f   : > { %v225_v25 = vld [vmem:[%s1140_s2 + $0x120] sm:$0xff]  ;;  %342 = vmatpush.msra.mxu1 %v293_v22  ;;  %v226_v27 = vld [vmem:[%s1140_s2 + $0x128] sm:$0xff]  ;;  %382 = vmatpush.msra.mxu3 %v294_v24  ;;  %v308_v12 = vld [vmem:[%s1140_s2 + $0x3b8] sm:$0xff] }
  0x20   : > { %v289_v26 = vld [vmem:[%s1140_s2 + $0x320] sm:$0xff]  ;;  %v290_v28 = vld [vmem:[%s1140_s2 + $0x328] sm:$0xff]  ;;  %323 = vmatpush.msra.mxu0 %v225_v25  ;;  %363 = vmatpush.msra.mxu2 %v226_v27  ;;  %v239_v13 = vld [vmem:[%s1140_s2 + $0x190] sm:$0xff] }
  0x21   : > { %v221_v29 = vld [vmem:[%s1140_s2 + $0x100] sm:$0xff]  ;;  %343 = vmatpush.msra.mxu1 %v289_v26  ;;  %v222_v31 = vld [vmem:[%s1140_s2 + $0x108] sm:$0xff]  ;;  %383 = vmatpush.msra.mxu3 %v290_v28  ;;  %v303_v14 = vld [vmem:[%s1140_s2 + $0x390] sm:$0xff] }
  0x22   : > { %v285_v30 = vld [vmem:[%s1140_s2 + $0x300] sm:$0xff]  ;;  %v286_v32 = vld [vmem:[%s1140_s2 + $0x308] sm:$0xff]  ;;  %324 = vmatpush.msra.mxu0 %v221_v29  ;;  %364 = vmatpush.msra.mxu2 %v222_v31  ;;  %v240_v15 = vld [vmem:[%s1140_s2 + $0x198] sm:$0xff] }
  0x23   : > { %v217_v33 = vld [vmem:[%s1140_s2 + $0xe0] sm:$0xff]  ;;  %344 = vmatpush.msra.mxu1 %v285_v30  ;;  %v218_v35 = vld [vmem:[%s1140_s2 + $0xe8] sm:$0xff]  ;;  %384 = vmatpush.msra.mxu3 %v286_v32  ;;  %v304_v16 = vld [vmem:[%s1140_s2 + $0x398] sm:$0xff] }
  0x24   : > { %v281_v34 = vld [vmem:[%s1140_s2 + $0x2e0] sm:$0xff]  ;;  %v282_v36 = vld [vmem:[%s1140_s2 + $0x2e8] sm:$0xff]  ;;  %325 = vmatpush.msra.mxu0 %v217_v33  ;;  %365 = vmatpush.msra.mxu2 %v218_v35  ;;  %v235_v17 = vld [vmem:[%s1140_s2 + $0x170] sm:$0xff] }
  0x25   : > { %v213_v37 = vld [vmem:[%s1140_s2 + $0xc0] sm:$0xff]  ;;  %345 = vmatpush.msra.mxu1 %v281_v34  ;;  %v214_v39 = vld [vmem:[%s1140_s2 + $0xc8] sm:$0xff]  ;;  %385 = vmatpush.msra.mxu3 %v282_v36  ;;  %v299_v18 = vld [vmem:[%s1140_s2 + $0x370] sm:$0xff] }
  0x26   : > { %v277_v38 = vld [vmem:[%s1140_s2 + $0x2c0] sm:$0xff]  ;;  %v278_v40 = vld [vmem:[%s1140_s2 + $0x2c8] sm:$0xff]  ;;  %326 = vmatpush.msra.mxu0 %v213_v37  ;;  %366 = vmatpush.msra.mxu2 %v214_v39  ;;  %v236_v19 = vld [vmem:[%s1140_s2 + $0x178] sm:$0xff] }
  0x27   : > { %v209_v41 = vld [vmem:[%s1140_s2 + $0xa0] sm:$0xff]  ;;  %346 = vmatpush.msra.mxu1 %v277_v38  ;;  %v210_v43 = vld [vmem:[%s1140_s2 + $0xa8] sm:$0xff]  ;;  %386 = vmatpush.msra.mxu3 %v278_v40  ;;  %v300_v20 = vld [vmem:[%s1140_s2 + $0x378] sm:$0xff] }
  0x28   : > { %v273_v42 = vld [vmem:[%s1140_s2 + $0x2a0] sm:$0xff]  ;;  %v274_v44 = vld [vmem:[%s1140_s2 + $0x2a8] sm:$0xff]  ;;  %327 = vmatpush.msra.mxu0 %v209_v41  ;;  %367 = vmatpush.msra.mxu2 %v210_v43  ;;  %v231_v21 = vld [vmem:[%s1140_s2 + $0x150] sm:$0xff] }
  0x29   : > { %v205_v45 = vld [vmem:[%s1140_s2 + $0x80] sm:$0xff]  ;;  %347 = vmatpush.msra.mxu1 %v273_v42  ;;  %v206_v47 = vld [vmem:[%s1140_s2 + $0x88] sm:$0xff]  ;;  %387 = vmatpush.msra.mxu3 %v274_v44  ;;  %v295_v22 = vld [vmem:[%s1140_s2 + $0x350] sm:$0xff] }
  0x2a   : > { %v269_v46 = vld [vmem:[%s1140_s2 + $0x280] sm:$0xff]  ;;  %v270_v48 = vld [vmem:[%s1140_s2 + $0x288] sm:$0xff]  ;;  %328 = vmatpush.msra.mxu0 %v205_v45  ;;  %368 = vmatpush.msra.mxu2 %v206_v47  ;;  %v232_v23 = vld [vmem:[%s1140_s2 + $0x158] sm:$0xff] }
  0x2b   : > { %v201_v49 = vld [vmem:[%s1140_s2 + $0x60] sm:$0xff]  ;;  %348 = vmatpush.msra.mxu1 %v269_v46  ;;  %v202_v51 = vld [vmem:[%s1140_s2 + $0x68] sm:$0xff]  ;;  %388 = vmatpush.msra.mxu3 %v270_v48  ;;  %v296_v24 = vld [vmem:[%s1140_s2 + $0x358] sm:$0xff] }
  0x2c   : > { %v265_v50 = vld [vmem:[%s1140_s2 + $0x260] sm:$0xff]  ;;  %v266_v52 = vld [vmem:[%s1140_s2 + $0x268] sm:$0xff]  ;;  %329 = vmatpush.msra.mxu0 %v201_v49  ;;  %369 = vmatpush.msra.mxu2 %v202_v51  ;;  %v227_v25 = vld [vmem:[%s1140_s2 + $0x130] sm:$0xff] }
  0x2d   : > { %v197_v53 = vld [vmem:[%s1140_s2 + $0x40] sm:$0xff]  ;;  %349 = vmatpush.msra.mxu1 %v265_v50  ;;  %v198_v55 = vld [vmem:[%s1140_s2 + $0x48] sm:$0xff]  ;;  %389 = vmatpush.msra.mxu3 %v266_v52  ;;  %v291_v26 = vld [vmem:[%s1140_s2 + $0x330] sm:$0xff] }
  0x2e   : > { %v261_v54 = vld [vmem:[%s1140_s2 + $0x240] sm:$0xff]  ;;  %v262_v56 = vld [vmem:[%s1140_s2 + $0x248] sm:$0xff]  ;;  %330 = vmatpush.msra.mxu0 %v197_v53  ;;  %370 = vmatpush.msra.mxu2 %v198_v55  ;;  %v228_v27 = vld [vmem:[%s1140_s2 + $0x138] sm:$0xff] }
  0x2f   : > { %v193_v57 = vld [vmem:[%s1140_s2 + $0x20] sm:$0xff]  ;;  %350 = vmatpush.msra.mxu1 %v261_v54  ;;  %v194_v59 = vld [vmem:[%s1140_s2 + $0x28] sm:$0xff]  ;;  %390 = vmatpush.msra.mxu3 %v262_v56  ;;  %v292_v28 = vld [vmem:[%s1140_s2 + $0x338] sm:$0xff] }
  0x30   : > { %v257_v58 = vld [vmem:[%s1140_s2 + $0x220] sm:$0xff]  ;;  %v258_v60 = vld [vmem:[%s1140_s2 + $0x228] sm:$0xff]  ;;  %331 = vmatpush.msra.mxu0 %v193_v57  ;;  %371 = vmatpush.msra.mxu2 %v194_v59  ;;  %v223_v29 = vld [vmem:[%s1140_s2 + $0x110] sm:$0xff] }
  0x31   : > { %v189_v61 = vld [vmem:[%s1140_s2] sm:$0xff]  ;;  %351 = vmatpush.msra.mxu1 %v257_v58  ;;  %v190_v63 = vld [vmem:[%s1140_s2 + $0x8] sm:$0xff]  ;;  %391 = vmatpush.msra.mxu3 %v258_v60  ;;  %v287_v30 = vld [vmem:[%s1140_s2 + $0x310] sm:$0xff] }
  0x32   : > { %v253_v62 = vld [vmem:[%s1140_s2 + $0x200] sm:$0xff]  ;;  %v254_v0 = vld [vmem:[%s1140_s2 + $0x208] sm:$0xff]  ;;  %332 = vmatpush.msra.mxu0 %v189_v61  ;;  %372 = vmatpush.msra.mxu2 %v190_v63  ;;  %v224_v31 = vld [vmem:[%s1140_s2 + $0x118] sm:$0xff] }
  0x33   : > { %352 = vmatpush.msra.mxu1 %v253_v62  ;;  %392 = vmatpush.msra.mxu3 %v254_v0  ;;  %v288_v32 = vld [vmem:[%s1140_s2 + $0x318] sm:$0xff]  ;;  %v219_v33 = vld [vmem:[%s1140_s2 + $0xf0] sm:$0xff]  ;;  %v183_v43 = vld [vmem:[%s734_s18] sm:$0xff] }
  0x34   : > { %397 = vmatpush.msrb.mxu0 %v251_v1  ;;  %437 = vmatpush.msrb.mxu2 %v252_v3  ;;  %v283_v34 = vld [vmem:[%s1140_s2 + $0x2f0] sm:$0xff]  ;;  %v220_v35 = vld [vmem:[%s1140_s2 + $0xf8] sm:$0xff]  ;;  %v185_v44 = vld [vmem:[%s739_s21] sm:$0xff] }
  0x35   : > { %417 = vmatpush.msrb.mxu1 %v315_v2  ;;  %457 = vmatpush.msrb.mxu3 %v316_v4  ;;  %v284_v36 = vld [vmem:[%s1140_s2 + $0x2f8] sm:$0xff]  ;;  %v215_v37 = vld [vmem:[%s1140_s2 + $0xd0] sm:$0xff]  ;;  %v184_v45 = vld [vmem:[%s734_s18 + $0x8] sm:$0xff]  ;;  %v187_v53 = vsub.f32 %v183_v43, %v185_v44 }
  0x36   : > { %398 = vmatpush.msrb.mxu0 %v247_v5  ;;  %438 = vmatpush.msrb.mxu2 %v248_v7  ;;  %v279_v38 = vld [vmem:[%s1140_s2 + $0x2d0] sm:$0xff]  ;;  %v216_v39 = vld [vmem:[%s1140_s2 + $0xd8] sm:$0xff]  ;;  %v186_v46 = vld [vmem:[%s739_s21 + $0x8] sm:$0xff] }
  0x37   : > { %418 = vmatpush.msrb.mxu1 %v311_v6  ;;  %458 = vmatpush.msrb.mxu3 %v312_v8  ;;  %v280_v40 = vld [vmem:[%s1140_s2 + $0x2d8] sm:$0xff]  ;;  %v211_v41 = vld [vmem:[%s1140_s2 + $0xb0] sm:$0xff]  ;;  %v188_v54 = vsub.f32 %v184_v45, %v186_v46 }
  0x38   : > { %399 = vmatpush.msrb.mxu0 %v243_v9  ;;  %439 = vmatpush.msrb.mxu2 %v244_v11  ;;  %v275_v42 = vld [vmem:[%s1140_s2 + $0x2b0] sm:$0xff]  ;;  %v212_v47 = vld [vmem:[%s1140_s2 + $0xb8] sm:$0xff] }
  0x39   : > { %419 = vmatpush.msrb.mxu1 %v307_v10  ;;  %459 = vmatpush.msrb.mxu3 %v308_v12  ;;  %v276_v48 = vld [vmem:[%s1140_s2 + $0x2b8] sm:$0xff]  ;;  %v207_v49 = vld [vmem:[%s1140_s2 + $0x90] sm:$0xff] }
  0x3a   : > { %400 = vmatpush.msrb.mxu0 %v239_v13  ;;  %440 = vmatpush.msrb.mxu2 %v240_v15  ;;  %v271_v50 = vld [vmem:[%s1140_s2 + $0x290] sm:$0xff]  ;;  %v208_v51 = vld [vmem:[%s1140_s2 + $0x98] sm:$0xff] }
  0x3b   : > { %420 = vmatpush.msrb.mxu1 %v303_v14  ;;  %460 = vmatpush.msrb.mxu3 %v304_v16  ;;  %v272_v52 = vld [vmem:[%s1140_s2 + $0x298] sm:$0xff]  ;;  %v203_v55 = vld [vmem:[%s1140_s2 + $0x70] sm:$0xff] }
  0x3c   : > { %401 = vmatpush.msrb.mxu0 %v235_v17  ;;  %441 = vmatpush.msrb.mxu2 %v236_v19  ;;  %v267_v56 = vld [vmem:[%s1140_s2 + $0x270] sm:$0xff]  ;;  %v204_v57 = vld [vmem:[%s1140_s2 + $0x78] sm:$0xff] }
  0x3d   : > { %421 = vmatpush.msrb.mxu1 %v299_v18  ;;  %461 = vmatpush.msrb.mxu3 %v300_v20  ;;  %v268_v58 = vld [vmem:[%s1140_s2 + $0x278] sm:$0xff]  ;;  %v199_v59 = vld [vmem:[%s1140_s2 + $0x50] sm:$0xff] }
  0x3e   : > { %402 = vmatpush.msrb.mxu0 %v231_v21  ;;  %442 = vmatpush.msrb.mxu2 %v232_v23  ;;  %v263_v60 = vld [vmem:[%s1140_s2 + $0x250] sm:$0xff]  ;;  %v200_v61 = vld [vmem:[%s1140_s2 + $0x58] sm:$0xff] }
  0x3f   : > { %422 = vmatpush.msrb.mxu1 %v295_v22  ;;  %462 = vmatpush.msrb.mxu3 %v296_v24  ;;  %v264_v62 = vld [vmem:[%s1140_s2 + $0x258] sm:$0xff]  ;;  %v195_v63 = vld [vmem:[%s1140_s2 + $0x30] sm:$0xff] }
  0x40   : > { %403 = vmatpush.msrb.mxu0 %v227_v25  ;;  %443 = vmatpush.msrb.mxu2 %v228_v27  ;;  %v259_v0 = vld [vmem:[%s1140_s2 + $0x230] sm:$0xff]  ;;  %v196_v1 = vld [vmem:[%s1140_s2 + $0x38] sm:$0xff] }
  0x41   : > { %423 = vmatpush.msrb.mxu1 %v291_v26  ;;  %463 = vmatpush.msrb.mxu3 %v292_v28  ;;  %v260_v2 = vld [vmem:[%s1140_s2 + $0x238] sm:$0xff]  ;;  %v191_v3 = vld [vmem:[%s1140_s2 + $0x10] sm:$0xff] }
  0x42   : > { %404 = vmatpush.msrb.mxu0 %v223_v29  ;;  %444 = vmatpush.msrb.mxu2 %v224_v31  ;;  %v255_v4 = vld [vmem:[%s1140_s2 + $0x210] sm:$0xff]  ;;  %v192_v5 = vld [vmem:[%s1140_s2 + $0x18] sm:$0xff] }
  0x43   : > { %424 = vmatpush.msrb.mxu1 %v287_v30  ;;  %464 = vmatpush.msrb.mxu3 %v288_v32  ;;  %v256_v6 = vld [vmem:[%s1140_s2 + $0x218] sm:$0xff] }
  0x44   : > { %405 = vmatpush.msrb.mxu0 %v219_v33  ;;  %445 = vmatpush.msrb.mxu2 %v220_v35 }
  0x45   : > { %425 = vmatpush.msrb.mxu1 %v283_v34  ;;  %465 = vmatpush.msrb.mxu3 %v284_v36 }
  0x46   : > { %406 = vmatpush.msrb.mxu0 %v215_v37  ;;  %446 = vmatpush.msrb.mxu2 %v216_v39 }
  0x47   : > { %426 = vmatpush.msrb.mxu1 %v279_v38  ;;  %466 = vmatpush.msrb.mxu3 %v280_v40 }
  0x48   : > { %407 = vmatpush.msrb.mxu0 %v211_v41  ;;  %447 = vmatpush.msrb.mxu2 %v212_v47 }
  0x49   : > { %427 = vmatpush.msrb.mxu1 %v275_v42  ;;  %467 = vmatpush.msrb.mxu3 %v276_v48 }
  0x4a   : > { %408 = vmatpush.msrb.mxu0 %v207_v49  ;;  %448 = vmatpush.msrb.mxu2 %v208_v51 }
  0x4b   : > { %428 = vmatpush.msrb.mxu1 %v271_v50  ;;  %468 = vmatpush.msrb.mxu3 %v272_v52 }
  0x4c   : > { %333 = vmatmul.f32.vlgmr.msra.gmra.mxu0 %v187_v53  ;;  %353 = vmatmul.f32.vlgmr.msra.gmra.mxu1 %v188_v54 }
  0x4d   : > { %373 = vmatmul.f32.vlgmr.msra.gmra.mxu2 %v187_v53  ;;  %393 = vmatmul.f32.vlgmr.msra.gmra.mxu3 %v188_v54 }
  0x4e   : > { %409 = vmatpush.msrb.mxu0 %v203_v55  ;;  %429 = vmatpush.msrb.mxu1 %v267_v56 }
  0x4f   : > { %449 = vmatpush.msrb.mxu2 %v204_v57  ;;  %469 = vmatpush.msrb.mxu3 %v268_v58 }
  0x50   : > { %410 = vmatpush.msrb.mxu0 %v199_v59  ;;  %430 = vmatpush.msrb.mxu1 %v263_v60 }
  0x51   : > { %450 = vmatpush.msrb.mxu2 %v200_v61  ;;  %470 = vmatpush.msrb.mxu3 %v264_v62 }
  0x52   : > { %411 = vmatpush.msrb.mxu0 %v195_v63  ;;  %431 = vmatpush.msrb.mxu1 %v259_v0 }
  0x53   : > { %451 = vmatpush.msrb.mxu2 %v196_v1  ;;  %471 = vmatpush.msrb.mxu3 %v260_v2 }
  0x54   : > { %412 = vmatpush.msrb.mxu0 %v191_v3  ;;  %432 = vmatpush.msrb.mxu1 %v255_v4 }
  0x55   : > { %452 = vmatpush.msrb.mxu2 %v192_v5  ;;  %472 = vmatpush.msrb.mxu3 %v256_v6 }
  0x56   : > { %413 = vmatmul.f32.vlgmr.msrb.gmra.mxu0 %v187_v53  ;;  %433 = vmatmul.f32.vlgmr.msrb.gmra.mxu1 %v188_v54 }
  0x57   : > { %453 = vmatmul.f32.vlgmr.msrb.gmra.mxu2 %v187_v53  ;;  %473 = vmatmul.f32.vlgmr.msrb.gmra.mxu3 %v188_v54 }
  0xc9   : > { %v334_v7 = vpop.f32.mrf.mxu0  ;;  %v354_v8 = vpop.f32.mrf.mxu1 }
  0xca   : > { %v355_v11 = vadd.f32 %v354_v8, %v334_v7 }
  0xcc   : > { %v477_v15 = vmul.f32 %v355_v11, %v355_v11 }
  0xd0   : > { %v374_v9 = vpop.f32.mrf.mxu2  ;;  %v394_v10 = vpop.f32.mrf.mxu3 }
  0xd1   : > { %v395_v18 = vadd.f32 %v394_v10, %v374_v9  ;;  %v533_v10 = vld [vmem:[#allocation2] sm:$0x1] }
  0xd3   : > { %v414_v12 = vpop.f32.mrf.mxu0  ;;  %v434_v13 = vpop.f32.mrf.mxu1  ;;  %v478_v22 = vmul.f32 %v395_v18, %v395_v18 }
  0xd4   : > { %v435_v14 = vadd.f32 %v434_v13, %v414_v12 }
  0xd6   : > { %v479_v16 = vmul.f32 %v435_v14, %v435_v14 }
  0xd8   : > { %v481_v17 = vadd.f32 %v479_v16, %v477_v15 }
  0xda   : > { %v454_v19 = vpop.f32.mrf.mxu2  ;;  %v474_v20 = vpop.f32.mrf.mxu3  ;;  %651 = vrsqrt.f32 %v481_v17  ;;  %vm490_vm1 = vcmp.eq.f32.partialorder %v481_v17, inf  ;;  %v493_v40 = vand.u32 2147483648, %v481_v17  ;;  %vm492_vm3 = vcmp.eq.f32.partialorder %v481_v17, 0.0 }
  0xdb   : > { %v475_v21 = vadd.f32 %v474_v20, %v454_v19 }
  0xdd   : > { %v480_v23 = vmul.f32 %v475_v21, %v475_v21 }
  0xdf   : > { %v482_v24 = vadd.f32 %v480_v23, %v478_v22 }
  0xe0   : > { %v652_v25 = vpop.eup %651 }
  0xe1   : > { %v484_v26 = vmul.f32 %v652_v25, %v481_v17  ;;  %653 = vrsqrt.f32 %v482_v24  ;;  %vm502_vm2 = vcmp.eq.f32.partialorder %v482_v24, inf  ;;  %v505_v41 = vand.u32 2147483648, %v482_v24 }
  0xe2   : > { %vm504_vm4 = vcmp.eq.f32.partialorder %v482_v24, 0.0 }
  0xe3   : > { %v485_v27 = vmul.f32 %v652_v25, %v484_v26 }
  0xe5   : > { %v486_v28 = vmul.f32 0.5, %v485_v27 }
  0xe7   : > { %v654_v29 = vpop.eup %653  ;;  %v487_v30 = vsub.f32 1.5, %v486_v28 }
  0xe8   : > { %v496_v31 = vmul.f32 %v654_v29, %v482_v24 }
  0xe9   : > { %v488_v32 = vmul.f32 %v652_v25, %v487_v30 }
  0xea   : > { %v497_v33 = vmul.f32 %v654_v29, %v496_v31 }
  0xeb   : > { %v489_v35 = vmul.f32 %v488_v32, %v481_v17 }
  0xec   : > { %v498_v34 = vmul.f32 0.5, %v497_v33 }
  0xed   : > { %v491_v38 = vsel %vm490_vm1, %v481_v17, %v489_v35 }
  0xee   : > { %v499_v36 = vsub.f32 1.5, %v498_v34  ;;  %v494_v43 = vsel %vm492_vm3, %v493_v40, %v491_v38 }
  0xf0   : > { %v500_v37 = vmul.f32 %v654_v29, %v499_v36 }
  0xf2   : > { %v501_v39 = vmul.f32 %v500_v37, %v482_v24 }
  0xf4   : > { %v503_v42 = vsel %vm502_vm2, %v482_v24, %v501_v39 }
  0xf5   : > { %v506_v44 = vsel %vm504_vm4, %v505_v41, %v503_v42 }
  0xf6   : > { %v507_v45 = vmax.f32 %v494_v43, %v506_v44 }
  0xf8   : > { %508 = vmax.xlane.f32.xlu0 %v507_v45 }
 0x16b   : > { %v509_v46 = vpop.xlane.xlu0 %508 }
 0x16c   : > { %655 = vrcp.f32 %v509_v46  ;;  %v522_v50 = vand.u32 2147483648, %v509_v46  ;;  %v520_v52 = vand.u32 2147483647, %v509_v46  ;;  %vm516_vm6 = vweird.f32 %v509_v46 }
 0x16d   : > { %vm510_vm9 = vcmp.gt.f32.partialorder %v509_v46, 0.0 }
 0x16e   : > { %v523_v54 = vor.u32 1.1754944e-38, %v522_v50  ;;  %vm521_vm8 = vcmp.eq.f32.partialorder %v520_v52, 8.507059e+37 }
 0x172   : > { %v656_v47 = vpop.eup %655 }
 0x173   : > { %v512_v48 = vmul.f32 %v656_v47, %v509_v46  ;;  %vm517_vm5 = vweird.f32 %v656_v47 }
 0x174   : > { %vm518_vm7 = vmor %vm516_vm6, %vm517_vm5 }
 0x175   : > { %v513_v49 = vsub.f32 1.0, %v512_v48 }
 0x177   : > { %v514_v51 = vmul.f32 %v656_v47, %v513_v49 }
 0x179   : > { %v515_v53 = vadd.f32 %v656_v47, %v514_v51 }
 0x17b   : > { %v519_v55 = vsel %vm518_vm7, %v656_v47, %v515_v53 }
 0x17c   : > { %v524_v56 = vsel %vm521_vm8, %v523_v54, %v519_v55 }
 0x17d   : > { %v526_v57 = vsel %vm510_vm9, %v524_v56, 0.0 }
 0x17e   : > { %v527_v58 = vmul.f32 %v526_v57, %v494_v43  ;;  %v528_v59 = vmul.f32 %v526_v57, %v506_v44 }
 0x180   : > { %v529_v60 = vmax.f32 %v527_v58, 0.0  ;;  %v530_v61 = vmax.f32 %v528_v59, 0.0 }
 0x182   : > { %v531_v62 = vmin.f32 %v529_v60, 1.0  ;;  %v532_v63 = vmin.f32 %v530_v61, 1.0 }
 0x184   : > { %v534_v0 = vmul.f32 %v531_v62, %v481_v17  ;;  %v535_v1 = vmul.f32 %v532_v63, %v482_v24 }
 0x186   : > { %v536_v2 = vadd.f32 %v535_v1, %v534_v0 }
 0x188   : > { %537 = vadd.xlane.f32.xlu0 %v536_v2 }
 0x1fb   : > { %v538_v3 = vpop.xlane.xlu0 %537 }
 0x1fc   : > { %v539_v4 = vrot.slane %v538_v3, 4 }
 0x1fe   : > { %v540_v5 = vadd.f32 %v539_v4, %v538_v3 }
 0x200   : > { %v541_v6 = vrot.slane %v540_v5, 2 }
 0x202   : > { %v542_v7 = vadd.f32 %v541_v6, %v540_v5 }
 0x204   : > { %v543_v8 = vrot.slane %v542_v7, 1 }
 0x206   : > { %v544_v9 = vadd.f32 %v543_v8, %v542_v7 }
 0x208   : > { %633 = vpush %v544_v9 }
 0x239   : > { %s634_s20 = spop %633  ;;  %553 = sbr.rel (%p626_p5) target bundleno = 584 (0x248), region = 40 }
 0x23a   : > { %v546_v11 = vstv %s634_s20 }
 0x23b   : > { %v547_v12 = vadd.f32 %v546_v11, %v533_v10 }
 0x23d   : > { %549 = vst.msk [vmem:[#allocation2] sm:$0x1] %vm548_vm10, %v547_v12 }
 0x244   : > { %v554_v13 = vld [vmem:[#allocation2] sm:$0x1] }
 0x245   : > { %v555_v14 = vmul.f32 0.00024414063, %v554_v13 }
 0x247   : > { %556 = vst.msk [vmem:[#allocation2] sm:$0x1] %vm548_vm10, %v555_v14 }
 0x248 PF: > { %p639_p6 = scmp.eq.s32.totalorder %s725_s13, 1  ;;  %s698_s22 = smov [#allocation2]  }
 0x249   : > { %s563_s23 = sshll.u32 %s698_s22, 4  ;;  %s565_s26 = sshll.u32 %s1141_s3, 4  ;;  %s564_s23 = int_to_ptr.vmem [resolvable:$true] %s563_s23  ;;  %s566_s26 = int_to_ptr.hbm [resolvable:$true] %s565_s26 }
 0x24a   : > { %636 = dma.vmem_to_hbm [thread:$0]  (%p639_p6), %s564_s23, 16, %s566_s26, [#allocation3]  }
 0x24b   : > { %690 = dma.done.wait (%p639_p6), [#allocation3], 16  }
 0x24c   : > { %692 = vsyncadd (%p639_p6), [#allocation3], 4294967280 }
 0x24d PF: > { %s14_s12 = sadd.s32 1, %s695_s12  }
 0x24e   : > { %p11_p7 = scmp.ge.s32.totalorder %s14_s12, 4  }
 0x250   :  { %13 = sbr.rel (!%p11_p7) target bundleno = 1 (0x1), region = 70 }
 0x255   :  { %579 = vsyncpa [#allocation3], 1 }
 0x256   :  { %581 = vsyncpa [#allocation3 + $0x1], 1 }

</bundles_post_ra>
